<compile_context>
chip_gen: v7x
topology: tpu7x:2x2x1
jax: 0.10.0
libtpu: 0.0.40
codegen_flags: <defaults>
</compile_context>

<pallas_src>
import functools

import jax
import jax.numpy as jnp
from jax.experimental import pallas as pl
from jax.experimental.pallas import tpu as pltpu

LANE = 128
SUBLANE = 8


def _round_up(n, m):
    return (n + m - 1) // m * m


def anet_kernel(x_ref, w1_ref, b1_ref, w2_ref, b2_ref, o_ref):
    """One (TB, 128) batch tile of the actor forward pass.

    x_ref : (TB, S_pad)   bf16   (streamed per grid step, double-buffered)
    w1_ref: (S_pad, H_pad) bf16  (VMEM-resident across the grid)
    b1_ref: (1, H_pad)     f32
    w2_ref: (H_pad, A_pad) bf16
    b2_ref: (1, A_pad)     f32
    o_ref : (TB, A_pad)    f32   lane-dense output slab
    """
    # fc1 + relu : bf16 MXU matmul, f32 accumulate, f32 epilogue (VPU).
    h = jnp.dot(x_ref[...], w1_ref[...], preferred_element_type=jnp.float32)
    h = jnp.maximum(h + b1_ref[...], 0.0)
    # out layer  : cast activations back to bf16 for the MXU, f32 accumulate.
    y = jnp.dot(h.astype(jnp.bfloat16), w2_ref[...],
                preferred_element_type=jnp.float32)
    y = y + b2_ref[...]
    # tanh lands on the EUP slot (free relative to MXU / load-store here).
    o_ref[...] = jnp.tanh(y) * 2.0


def prepare_anet_params(w1, b1, w2, b2):
    """Pad all lane dims to 128, zero-fill padding, cast matmul weights to bf16.

    Done once (outside the per-step call path).  w1 is (s_dim, 30), w2 is
    (30, a_dim) -- i.e. already the transposed nn.Linear weights.
    Zero padding keeps the math exact: padded rows/cols contribute 0 and
    relu(0 + 0) = 0 feeds zero columns of w2.
    """
    s_dim, hidden = w1.shape
    a_dim = w2.shape[1]
    s_pad = _round_up(s_dim, LANE)
    h_pad = _round_up(hidden, LANE)
    a_pad = _round_up(a_dim, LANE)

    w1p = jnp.zeros((s_pad, h_pad), jnp.bfloat16)
    w1p = w1p.at[:s_dim, :hidden].set(w1.astype(jnp.bfloat16))
    b1p = jnp.zeros((1, h_pad), jnp.float32)
    b1p = b1p.at[:, :hidden].set(b1.reshape(1, hidden).astype(jnp.float32))
    w2p = jnp.zeros((h_pad, a_pad), jnp.bfloat16)
    w2p = w2p.at[:hidden, :a_dim].set(w2.astype(jnp.bfloat16))
    b2p = jnp.zeros((1, a_pad), jnp.float32)
    b2p = b2p.at[:, :a_dim].set(b2.reshape(1, a_dim).astype(jnp.float32))
    return w1p, b1p, w2p, b2p


@functools.partial(jax.jit, static_argnames=("a_dim", "block_b"))
def anet_forward(x, w1p, b1p, w2p, b2p, *, a_dim, block_b=512):
    """x: (B, s_dim) f32.  Padded/cast params from prepare_anet_params."""
    B, s_dim = x.shape
    s_pad, h_pad = w1p.shape
    a_pad = w2p.shape[1]

    # Batch tile: as large as block_b (a multiple of 8), but tiny batches
    # collapse to a single grid step.
    tb = min(_round_up(block_b, SUBLANE), _round_up(B, SUBLANE))
    b_pad = _round_up(B, tb)

    # Lane-pad + bf16-cast the activations (halves HBM traffic for x).
    xp = jnp.pad(x.astype(jnp.bfloat16),
                 ((0, b_pad - B), (0, s_pad - s_dim)))

    out = pl.pallas_call(
        anet_kernel,
        out_shape=jax.ShapeDtypeStruct((b_pad, a_pad), jnp.float32),
        grid=(b_pad // tb,),
        in_specs=[
            pl.BlockSpec((tb, s_pad), lambda i: (i, 0)),      # x: streamed tiles
            pl.BlockSpec((s_pad, h_pad), lambda i: (0, 0)),   # weights stay resident
            pl.BlockSpec((1, h_pad), lambda i: (0, 0)),
            pl.BlockSpec((h_pad, a_pad), lambda i: (0, 0)),
            pl.BlockSpec((1, a_pad), lambda i: (0, 0)),
        ],
        out_specs=pl.BlockSpec((tb, a_pad), lambda i: (i, 0)),
        compiler_params=pltpu.CompilerParams(
            # Batch tiles are independent -> shard across v7x's two TCs.
            dimension_semantics=("parallel",),
        ),
    )(xp, w1p, b1p, w2p, b2p)

    # Slice the real actions back out of the lane-dense slab.
    return out[:B, :a_dim]


def anet_reference(x, w1, b1, w2, b2, *, bf16):
    """Pure-JAX reference.  bf16=True reproduces the kernel's rounding points."""
    if bf16:
        f = lambda a: a.astype(jnp.bfloat16).astype(jnp.float32)
    else:
        f = lambda a: a
    h = jnp.maximum(f(x) @ f(w1) + b1, 0.0)
    h = f(h)
    return jnp.tanh(h @ f(w2) + b2) * 2.0


if __name__ == "__main__":
    s_dim, a_dim, hidden, batch = 16, 4, 30, 8

    key = jax.random.PRNGKey(0)
    kx, kw1, kb1, kw2, kb2 = jax.random.split(key, 5)

    # Deterministic parameter init mirroring the module's __init__:
    #   weights ~ N(0, 0.1); biases random small values (stand-in for default init).
    w1 = (0.1 * jax.random.normal(kw1, (s_dim, hidden))).astype(jnp.float32)   # fc1.weight^T
    b1 = (0.1 * jax.random.normal(kb1, (1, hidden))).astype(jnp.float32)       # fc1.bias
    w2 = (0.1 * jax.random.normal(kw2, (hidden, a_dim))).astype(jnp.float32)   # out.weight^T
    b2 = (0.1 * jax.random.normal(kb2, (1, a_dim))).astype(jnp.float32)        # out.bias

    x = jax.random.normal(kx, (batch, s_dim), dtype=jnp.float32)

    # One-time parameter padding / casting.
    w1p, b1p, w2p, b2p = prepare_anet_params(w1, b1, w2, b2)

    out = anet_forward(x, w1p, b1p, w2p, b2p, a_dim=a_dim)
    out = jax.block_until_ready(out)
    assert out.shape == (batch, a_dim)

    # Tight check against a reference with identical bf16 rounding points.
    ref_bf16 = anet_reference(x, w1, b1, w2, b2, bf16=True)
    assert jnp.allclose(out, ref_bf16, atol=1e-3, rtol=1e-3), \
        "Pallas kernel mismatch vs bf16-matched reference"

    # Loose check against the full-f32 PyTorch-semantics reference.
    ref_f32 = anet_reference(x, w1, b1, w2, b2, bf16=False)
    assert jnp.allclose(out, ref_f32, atol=3e-2, rtol=3e-2), \
        "Pallas kernel drifted too far from f32 reference"

    print("KERNEL_OK")
</pallas_src>

<mosaic_0001>
module attributes {stable_mosaic.version = 11 : i64} {
  func.func @anet_kernel(%arg0: i32, %arg1: memref<8x128xbf16, #tpu.memory_space<vmem>>, %arg2: memref<128x128xbf16, #tpu.memory_space<vmem>>, %arg3: memref<1x128xf32, #tpu.memory_space<vmem>>, %arg4: memref<128x128xbf16, #tpu.memory_space<vmem>>, %arg5: memref<1x128xf32, #tpu.memory_space<vmem>>, %arg6: memref<8x128xf32, #tpu.memory_space<vmem>>) attributes {dimension_semantics = [#tpu.dimension_semantics<parallel>], iteration_bounds = array<i64: 1>, scalar_prefetch = 0 : i64, scratch_operands = 0 : i64, tpu.core_type = #tpu.core_type<tc>, window_params = [{transform_indices = @transform_0, window_bounds = array<i64: 8, 128>}, {pipeline_mode = #tpu.pipeline_mode<synchronous>, transform_indices = @transform_1, window_bounds = array<i64: 128, 128>}, {pipeline_mode = #tpu.pipeline_mode<synchronous>, transform_indices = @transform_2, window_bounds = array<i64: 1, 128>}, {pipeline_mode = #tpu.pipeline_mode<synchronous>, transform_indices = @transform_3, window_bounds = array<i64: 128, 128>}, {pipeline_mode = #tpu.pipeline_mode<synchronous>, transform_indices = @transform_4, window_bounds = array<i64: 1, 128>}, {transform_indices = @transform_5, window_bounds = array<i64: 8, 128>}]} {
    %c0 = arith.constant 0 : index
    %c0_0 = arith.constant 0 : index
    %0 = vector.load %arg1[%c0, %c0_0] : memref<8x128xbf16, #tpu.memory_space<vmem>>, vector<8x128xbf16>
    %c0_1 = arith.constant 0 : index
    %c0_2 = arith.constant 0 : index
    %1 = vector.load %arg2[%c0_1, %c0_2] : memref<128x128xbf16, #tpu.memory_space<vmem>>, vector<128x128xbf16>
    %cst = arith.constant dense<0.000000e+00> : vector<8x128xf32>
    %2 = tpu.matmul %0, %1, %cst {dimension_numbers = #tpu.dot_dimension_numbers<[1], [0], [0], [1], [0, 0, 1, 1], [], []>} : vector<8x128xbf16>, vector<128x128xbf16>, vector<8x128xf32> -> vector<8x128xf32>
    %c0_3 = arith.constant 0 : index
    %c0_4 = arith.constant 0 : index
    %3 = vector.load %arg3[%c0_3, %c0_4] : memref<1x128xf32, #tpu.memory_space<vmem>>, vector<1x128xf32>
    %4 = vector.broadcast %3 : vector<1x128xf32> to vector<8x128xf32>
    %5 = arith.addf %2, %4 : vector<8x128xf32>
    %cst_5 = arith.constant 0.000000e+00 : f32
    %6 = vector.broadcast %cst_5 : f32 to vector<8x128xf32>
    %7 = arith.maximumf %5, %6 : vector<8x128xf32>
    %8 = arith.truncf %7 : vector<8x128xf32> to vector<8x128xbf16>
    %c0_6 = arith.constant 0 : index
    %c0_7 = arith.constant 0 : index
    %9 = vector.load %arg4[%c0_6, %c0_7] : memref<128x128xbf16, #tpu.memory_space<vmem>>, vector<128x128xbf16>
    %cst_8 = arith.constant dense<0.000000e+00> : vector<8x128xf32>
    %10 = tpu.matmul %8, %9, %cst_8 {dimension_numbers = #tpu.dot_dimension_numbers<[1], [0], [0], [1], [0, 0, 1, 1], [], []>} : vector<8x128xbf16>, vector<128x128xbf16>, vector<8x128xf32> -> vector<8x128xf32>
    %c0_9 = arith.constant 0 : index
    %c0_10 = arith.constant 0 : index
    %11 = vector.load %arg5[%c0_9, %c0_10] : memref<1x128xf32, #tpu.memory_space<vmem>>, vector<1x128xf32>
    %12 = vector.broadcast %11 : vector<1x128xf32> to vector<8x128xf32>
    %13 = arith.addf %10, %12 : vector<8x128xf32>
    %14 = math.tanh %13 : vector<8x128xf32>
    %cst_11 = arith.constant 2.000000e+00 : f32
    %15 = vector.broadcast %cst_11 : f32 to vector<8x128xf32>
    %16 = arith.mulf %14, %15 : vector<8x128xf32>
    %c0_12 = arith.constant 0 : index
    %c0_13 = arith.constant 0 : index
    %17 = vector.load %arg6[%c0_12, %c0_13] : memref<8x128xf32, #tpu.memory_space<vmem>>, vector<8x128xf32>
    tpu.vector_store %arg6[%c0_12, %c0_13], %16 {strides = array<i32>} : memref<8x128xf32, #tpu.memory_space<vmem>>, vector<8x128xf32>,
    return
  }
  func.func @transform_0(%arg0: i32) -> (i32, i32) {
    %c0_i32 = arith.constant 0 : i32
    %c0_i32_0 = arith.constant 0 : i32
    return %arg0, %c0_i32 : i32, i32
  }
  func.func @transform_1(%arg0: i32) -> (i32, i32) {
    %c0_i32 = arith.constant 0 : i32
    %c0_i32_0 = arith.constant 0 : i32
    %c0_i32_1 = arith.constant 0 : i32
    return %c0_i32, %c0_i32_0 : i32, i32
  }
  func.func @transform_2(%arg0: i32) -> (i32, i32) {
    %c0_i32 = arith.constant 0 : i32
    %c0_i32_0 = arith.constant 0 : i32
    %c0_i32_1 = arith.constant 0 : i32
    return %c0_i32, %c0_i32_0 : i32, i32
  }
  func.func @transform_3(%arg0: i32) -> (i32, i32) {
    %c0_i32 = arith.constant 0 : i32
    %c0_i32_0 = arith.constant 0 : i32
    %c0_i32_1 = arith.constant 0 : i32
    return %c0_i32, %c0_i32_0 : i32, i32
  }
  func.func @transform_4(%arg0: i32) -> (i32, i32) {
    %c0_i32 = arith.constant 0 : i32
    %c0_i32_0 = arith.constant 0 : i32
    %c0_i32_1 = arith.constant 0 : i32
    return %c0_i32, %c0_i32_0 : i32, i32
  }
  func.func @transform_5(%arg0: i32) -> (i32, i32) {
    %c0_i32 = arith.constant 0 : i32
    %c0_i32_0 = arith.constant 0 : i32
    return %arg0, %c0_i32 : i32, i32
  }
}

</mosaic_0001>

<bundles_post_ra>
// kernel: anet_forward.1
= control target key start
LH: loop header
LB: loop body
LE: loop exit
PB: predicated region body
PF: predicated region fallthrough
CT: control target
= control target key end

     0   :  { %10 = vsyncpa [#allocation3], 0  ;;  %s503_s0 = inlined_call_operand.vmem [shape: bf16[8,128], index: 0, kind: input, shape index: {}]   ;;  %s504_s1 = inlined_call_operand.hbm [shape: bf16[128,128], index: 1, kind: input, shape index: {}]   ;;  %s505_s2 = inlined_call_operand.vmem [shape: f32[1,128], index: 2, kind: input, shape index: {}]   ;;  %s506_s3 = inlined_call_operand.hbm [shape: bf16[128,128], index: 3, kind: input, shape index: {}]   ;;  %s507_s4 = inlined_call_operand.vmem [shape: f32[1,128], index: 4, kind: input, shape index: {}]   ;;  %s508_s5 = inlined_call_operand.vmem [shape: f32[8,128], index: 5, kind: output, shape index: {}]  }
   0x1   :  { %11 = vsyncpa [#allocation5], 0  ;;  %s431_s18 = smov [#allocation2]   ;;  %s383_s22 = scalar_lea.hbm %s504_s1, 1024 }
   0x2   :  { %s19_s19 = sshll.u32 %s431_s18, 4  ;;  %p384_p0 = scmp.ne.s32.totalorder %s504_s1, %s383_s22  ;;  %s20_s19 = int_to_ptr.vmem [resolvable:$true] %s19_s19 }
   0x3   :  { %p387_p1 = scmp.lt.u32.totalorder %s383_s22, %s504_s1 }
   0x5   :  { %p389_p2 = pnand %p387_p1, %p384_p0 }
   0x7   :  { %392 = shalt.err (!%p389_p2)
}
   0x8   :  { %s393_s27 = scalar_lea.vmem %s20_s19, 1024  ;;  %p398_p4 = scmp.lt.s32.totalorder %s20_s19, %s20_s19 }
   0x9   :  { %p394_p3 = scmp.ne.s32.totalorder %s20_s19, %s393_s27  ;;  %p399_p5 = scmp.lt.s32.totalorder %s393_s27, %s393_s27 }
   0xb   :  { %p400_p6 = por %p399_p5, %p398_p4 }
   0xd   :  { %p401_p7 = pnand %p400_p6, %p394_p3 }
   0xf   :  { %404 = shalt.err (!%p401_p7)
}
  0x10   :  { %s432_s28 = smov 64   ;;  %s433_s29 = smov 4  }
  0x11   :  { %25 = dma.hbm_to_vmem [thread:$0]  %s504_s1, 1024, %s20_s19, [#allocation3], %s432_s28, %s432_s28, %s433_s29  }
  0x12   :  { %s434_s7 = smov [#allocation4]   ;;  %s405_s11 = scalar_lea.hbm %s506_s3, 1024 }
  0x13   :  { %s33_s8 = sshll.u32 %s434_s7, 4  ;;  %p406_p8 = scmp.ne.s32.totalorder %s506_s3, %s405_s11  ;;  %s34_s8 = int_to_ptr.vmem [resolvable:$true] %s33_s8 }
  0x14   :  { %p409_p9 = scmp.lt.u32.totalorder %s405_s11, %s506_s3 }
  0x16   :  { %p411_p10 = pnand %p409_p9, %p406_p8 }
  0x18   :  { %414 = shalt.err (!%p411_p10)
}
  0x19   :  { %s415_s16 = scalar_lea.vmem %s34_s8, 1024  ;;  %p420_p12 = scmp.lt.s32.totalorder %s34_s8, %s34_s8 }
  0x1a   :  { %p416_p11 = scmp.ne.s32.totalorder %s34_s8, %s415_s16  ;;  %p421_p13 = scmp.lt.s32.totalorder %s415_s16, %s415_s16 }
  0x1c   :  { %p422_p0 = por %p421_p13, %p420_p12 }
  0x1e   :  { %p423_p1 = pnand %p422_p0, %p416_p11 }
  0x20   :  { %426 = shalt.err (!%p423_p1)
}
  0x21   :  { %39 = dma.hbm_to_vmem [thread:$0]  %s506_s3, 1024, %s34_s8, [#allocation5], %s432_s28, %s432_s28, %s433_s29  }
  0x22   :  { %427 = dma.done.wait [#allocation3], 1024  }
  0x23   :  { %428 = vsyncadd [#allocation3], 4294966272 }
  0x24   :  { %429 = dma.done.wait [#allocation5], 1024  }
  0x25   :  { %430 = vsyncadd [#allocation5], 4294966272  ;;  %v435_v0 = vmov 0.0   ;;  %vm436_vm0 = vmmov 0   ;;  %v365_v1 = vld [vmem:[#allocation2] sm:$0xff]   ;;  %v366_v2 = vld [vmem:[#allocation2 + $0x8] sm:$0xff]  }
  0x26   :  { %319 = vmatprep.subr.bf16.mxu0 %v435_v0  ;;  %335 = vmatprep.mubr.msk.bf16.mxu0 %vm436_vm0, %v435_v0  ;;  %v367_v3 = vld [vmem:[#allocation2 + $0x10] sm:$0xff]   ;;  %v373_v4 = vld [vmem:[#allocation4] sm:$0xff]   ;;  %v368_v5 = vld [vmem:[#allocation2 + $0x18] sm:$0xff]  }
  0x27   :  { %339 = vmatprep.subr.bf16.mxu1 %v435_v0  ;;  %355 = vmatprep.mubr.msk.bf16.mxu1 %vm436_vm0, %v435_v0  ;;  %v374_v6 = vld [vmem:[#allocation4 + $0x8] sm:$0xff]   ;;  %v369_v7 = vld [vmem:[#allocation2 + $0x20] sm:$0xff]   ;;  %v375_v8 = vld [vmem:[#allocation4 + $0x10] sm:$0xff]  }
  0x28   :  { %320 = vmatpush3.bf16.msra.mxu0 %v365_v1  ;;  %340 = vmatpush3.bf16.msra.mxu1 %v373_v4  ;;  %v370_v9 = vld [vmem:[#allocation2 + $0x28] sm:$0xff]   ;;  %v376_v10 = vld [vmem:[#allocation4 + $0x18] sm:$0xff]   ;;  %v371_v11 = vld [vmem:[#allocation2 + $0x30] sm:$0xff]  }
  0x29   :  { %321 = vmatprep.subr.bf16.mxu0 %v435_v0  ;;  %341 = vmatprep.subr.bf16.mxu1 %v435_v0  ;;  %v377_v12 = vld [vmem:[#allocation4 + $0x20] sm:$0xff]   ;;  %v372_v13 = vld [vmem:[#allocation2 + $0x38] sm:$0xff]   ;;  %v378_v14 = vld [vmem:[#allocation4 + $0x28] sm:$0xff]  }
  0x2a   :  { %v49_v15 = vld [vmem:[%s503_s0] sm:$0xf]  ;;  %v379_v16 = vld [vmem:[#allocation4 + $0x30] sm:$0xff]   ;;  %v380_v17 = vld [vmem:[#allocation4 + $0x38] sm:$0xff]  }
  0x2b   :  { %v283_v18 = vld [vmem:[%s505_s2] ss:$0 sm:$0xff] }
  0x2c   :  { %322 = vmatpush3.bf16.msra.mxu0 %v366_v2  ;;  %342 = vmatpush3.bf16.msra.mxu1 %v374_v6  ;;  %v292_v26 = vld [vmem:[%s507_s4] ss:$0 sm:$0xff] }
  0x2d   :  { %323 = vmatprep.subr.bf16.mxu0 %v435_v0  ;;  %343 = vmatprep.subr.bf16.mxu1 %v435_v0 }
  0x30   :  { %324 = vmatpush3.bf16.msra.mxu0 %v367_v3  ;;  %344 = vmatpush3.bf16.msra.mxu1 %v375_v8 }
  0x31   :  { %325 = vmatprep.subr.bf16.mxu0 %v435_v0  ;;  %345 = vmatprep.subr.bf16.mxu1 %v435_v0 }
  0x34   :  { %326 = vmatpush3.bf16.msra.mxu0 %v368_v5  ;;  %346 = vmatpush3.bf16.msra.mxu1 %v376_v10 }
  0x35   :  { %327 = vmatprep.subr.bf16.mxu0 %v435_v0  ;;  %347 = vmatprep.subr.bf16.mxu1 %v435_v0 }
  0x38   :  { %328 = vmatpush3.bf16.msra.mxu0 %v369_v7  ;;  %348 = vmatpush3.bf16.msra.mxu1 %v377_v12 }
  0x39   :  { %329 = vmatprep.subr.bf16.mxu0 %v435_v0  ;;  %349 = vmatprep.subr.bf16.mxu1 %v435_v0 }
  0x3c   :  { %330 = vmatpush3.bf16.msra.mxu0 %v370_v9  ;;  %350 = vmatpush3.bf16.msra.mxu1 %v378_v14 }
  0x3d   :  { %331 = vmatprep.subr.bf16.mxu0 %v435_v0  ;;  %351 = vmatprep.subr.bf16.mxu1 %v435_v0 }
  0x40   :  { %332 = vmatpush3.bf16.msra.mxu0 %v371_v11  ;;  %352 = vmatpush3.bf16.msra.mxu1 %v379_v16 }
  0x41   :  { %333 = vmatprep.subr.bf16.mxu0 %v435_v0  ;;  %353 = vmatprep.subr.bf16.mxu1 %v435_v0 }
  0x44   :  { %334 = vmatpush3.bf16.msra.mxu0 %v372_v13  ;;  %354 = vmatpush3.bf16.msra.mxu1 %v380_v17 }
  0x47   :  { %336 = vmatmul.mubr.bf16.vlgmr.msra.gmra.mrb[0].mxu0 %v49_v15 }
 0x11a   :  { %v155_v19 = vpop.f32.mrb[0].mxu0 }
 0x11b   :  { %v156_v20 = vadd.f32 %v283_v18, %v155_v19  ;;  %v337_v21 = vpop.f32.mrb[1].mxu0 }
 0x11c   :  { %v158_v22 = vpop.f32.mrb[2].mxu0 }
 0x11d   :  { %v161_v23 = vmax.f32 %v156_v20, 0.0  ;;  %v338_v24 = vpop.f32.mrb[3].mxu0 }
 0x11f   :  { %v162_v25 = vpack.c.bf16 %v161_v23, %v161_v23 }
 0x121   :  { %356 = vmatmul.mubr.bf16.vlgmr.msra.gmra.mrb[0].mxu1 %v162_v25 }
 0x1f4   :  { %v268_v27 = vpop.f32.mrb[0].mxu1 }
 0x1f5   :  { %v269_v28 = vadd.f32 %v292_v26, %v268_v27  ;;  %v357_v29 = vpop.f32.mrb[1].mxu1 }
 0x1f6   :  { %v271_v30 = vpop.f32.mrb[2].mxu1 }
 0x1f7   :  { %381 = vtanh.f32 %v269_v28  ;;  %v358_v31 = vpop.f32.mrb[3].mxu1 }
 0x201   :  { %v382_v32 = vpop.eup %381 }
 0x202   :  { %v275_v33 = vmul.f32 2.0, %v382_v32 }
 0x204   :  { %276 = vst [vmem:[%s508_s5] sm:$0xff] %v275_v33 }
 0x205   :  { %281 = vsyncpa [#allocation3], 1 }
 0x206   :  { %282 = vsyncpa [#allocation5], 1 }

</bundles_post_ra>
